<compile_context>
chip_gen: v7x
topology: tpu7x:2x2x1
jax: 0.10.0
libtpu: 0.0.40
codegen_flags: <defaults>
</compile_context>

<pallas_src>
import jax
import jax.numpy as jnp
from jax import lax
from jax.experimental import pallas as pl
from jax.experimental.pallas import tpu as pltpu


def _round_up(x: int, m: int) -> int:
    return (x + m - 1) // m * m


def dense_relu_kernel(x_ref, w_ref, b_ref, o_ref, acc_ref):
    """One (tm, tn) output tile, accumulated over the K grid axis.

    x_ref: (tm, tk)   activation tile
    w_ref: (tn, tk)   weight tile in PyTorch [Cout, Cin] layout
    b_ref: (1,  tn)   bias tile (indexed by the N grid axis only)
    o_ref: (tm, tn)   output tile
    acc_ref: (tm, tn) f32 accumulator scratch (VMEM, persists across K steps)
    """
    k = pl.program_id(2)

    @pl.when(k == 0)
    def _():
        acc_ref[...] = jnp.zeros_like(acc_ref)

    # x @ W.T without materializing a transpose: contract last dims of both.
    acc_ref[...] += lax.dot_general(
        x_ref[...], w_ref[...],
        dimension_numbers=(((1,), (1,)), ((), ())),
        preferred_element_type=jnp.float32,
    )

    @pl.when(k == pl.num_programs(2) - 1)
    def _():
        y = acc_ref[...] + b_ref[...]            # (1, tn) broadcasts over rows
        o_ref[...] = jnp.maximum(y, 0.0).astype(o_ref.dtype)


def dense_layer(x, weight, bias, *, tm_cap=256, tn_cap=256, tk_cap=512):
    """x: [B, Cin]; weight: [Cout, Cin] (PyTorch layout); bias: [Cout]."""
    B, Cin = x.shape
    Cout = weight.shape[0]
    out_dtype = x.dtype

    # ---- tile sizes: lane dims (tk, tn) 128-aligned, sublane dim (tm) 8-aligned.
    tm = min(tm_cap, _round_up(B, 8))
    tn = min(tn_cap, _round_up(Cout, 128))
    tk = min(tk_cap, _round_up(Cin, 128))

    # ---- pad the problem to whole tiles (zeros contribute nothing to the dot;
    #      padded rows/cols are sliced off after the call).
    Bp = _round_up(B, tm)
    Np = _round_up(Cout, tn)
    Kp = _round_up(Cin, tk)

    x_p = jnp.pad(x, ((0, Bp - B), (0, Kp - Cin)))
    w_p = jnp.pad(weight, ((0, Np - Cout), (0, Kp - Cin)))
    b_p = jnp.pad(bias, (0, Np - Cout)).reshape(1, Np)

    grid = (Bp // tm, Np // tn, Kp // tk)

    cost = pl.CostEstimate(
        flops=2 * Bp * Kp * Np,
        transcendentals=0,
        bytes_accessed=4 * (Bp * Kp + Np * Kp + Np + Bp * Np),
    )

    out_p = pl.pallas_call(
        dense_relu_kernel,
        out_shape=jax.ShapeDtypeStruct((Bp, Np), out_dtype),
        grid_spec=pltpu.PrefetchScalarGridSpec(
            num_scalar_prefetch=0,
            grid=grid,
            in_specs=[
                pl.BlockSpec((tm, tk), lambda i, j, k: (i, k)),   # x
                pl.BlockSpec((tn, tk), lambda i, j, k: (j, k)),   # weight [Cout,Cin]
                pl.BlockSpec((1, tn), lambda i, j, k: (0, j)),    # bias
            ],
            out_specs=pl.BlockSpec((tm, tn), lambda i, j, k: (i, j)),
            scratch_shapes=[pltpu.VMEM((tm, tn), jnp.float32)],
        ),
        compiler_params=pltpu.CompilerParams(
            dimension_semantics=("parallel", "parallel", "arbitrary"),
            vmem_limit_bytes=48 * 1024 * 1024,   # fits v7x's 64 MiB physical VMEM
        ),
        cost_estimate=cost,
    )(x_p, w_p, b_p)

    return out_p[:B, :Cout]


if __name__ == "__main__":
    # Small shapes consistent with DenseLayer(in_channels=32, out_channels=16)
    B, Cin, Cout = 8, 32, 16
    key = jax.random.PRNGKey(0)
    kx, kw, kb = jax.random.split(key, 3)

    x = jax.random.normal(kx, (B, Cin), dtype=jnp.float32)
    # Mimic nn.Linear's uniform(-1/sqrt(Cin), 1/sqrt(Cin)) init deterministically
    bound = 1.0 / (Cin ** 0.5)
    weight = jax.random.uniform(kw, (Cout, Cin), minval=-bound, maxval=bound,
                                dtype=jnp.float32)
    bias = jax.random.uniform(kb, (Cout,), minval=-bound, maxval=bound,
                              dtype=jnp.float32)

    out = dense_layer(x, weight, bias)
    jax.block_until_ready(out)

    # Cross-check against plain-JAX reference of the PyTorch forward
    ref = jnp.maximum(x @ weight.T + bias, 0.0)
    assert out.shape == (B, Cout)
    assert jnp.allclose(out, ref, atol=1e-5, rtol=1e-5)

    print("KERNEL_OK")
</pallas_src>

<mosaic_0001>
module attributes {stable_mosaic.version = 11 : i64} {
  func.func @dense_relu_kernel(%arg0: i32, %arg1: i32, %arg2: i32, %arg3: memref<8x128xf32, #tpu.memory_space<vmem>>, %arg4: memref<128x128xf32, #tpu.memory_space<vmem>>, %arg5: memref<1x128xf32, #tpu.memory_space<vmem>>, %arg6: memref<8x128xf32, #tpu.memory_space<vmem>>, %arg7: memref<8x128xf32, #tpu.memory_space<vmem>>) attributes {dimension_semantics = [#tpu.dimension_semantics<parallel>, #tpu.dimension_semantics<parallel>, #tpu.dimension_semantics<arbitrary>], iteration_bounds = array<i64: 1, 1, 1>, scalar_prefetch = 0 : i64, scratch_operands = 1 : i64, tpu.core_type = #tpu.core_type<tc>, window_params = [{transform_indices = @transform_0, window_bounds = array<i64: 8, 128>}, {transform_indices = @transform_1, window_bounds = array<i64: 128, 128>}, {transform_indices = @transform_2, window_bounds = array<i64: 1, 128>}, {transform_indices = @transform_3, window_bounds = array<i64: 8, 128>}]} {
    %c0_i32 = arith.constant 0 : i32
    %0 = arith.cmpi eq, %arg2, %c0_i32 : i32
    %1 = arith.extui %0 : i1 to i32
    %c0_i32_0 = arith.constant 0 : i32
    %2 = arith.cmpi ne, %1, %c0_i32_0 : i32
    scf.if %2 {
      %cst_10 = arith.constant 0.000000e+00 : f32
      %12 = vector.broadcast %cst_10 : f32 to vector<8x128xf32>
      %c0_11 = arith.constant 0 : index
      %c0_12 = arith.constant 0 : index
      %13 = vector.load %arg7[%c0_11, %c0_12] : memref<8x128xf32, #tpu.memory_space<vmem>>, vector<8x128xf32>
      tpu.vector_store %arg7[%c0_11, %c0_12], %12 {strides = array<i32>} : memref<8x128xf32, #tpu.memory_space<vmem>>, vector<8x128xf32>,
    } else {
    }
    %c0 = arith.constant 0 : index
    %c0_1 = arith.constant 0 : index
    %3 = vector.load %arg7[%c0, %c0_1] : memref<8x128xf32, #tpu.memory_space<vmem>>, vector<8x128xf32>
    %c0_2 = arith.constant 0 : index
    %c0_3 = arith.constant 0 : index
    %4 = vector.load %arg3[%c0_2, %c0_3] : memref<8x128xf32, #tpu.memory_space<vmem>>, vector<8x128xf32>
    %c0_4 = arith.constant 0 : index
    %c0_5 = arith.constant 0 : index
    %5 = vector.load %arg4[%c0_4, %c0_5] : memref<128x128xf32, #tpu.memory_space<vmem>>, vector<128x128xf32>
    %cst = arith.constant dense<0.000000e+00> : vector<8x128xf32>
    %6 = tpu.matmul %4, %5, %cst {dimension_numbers = #tpu.dot_dimension_numbers<[1], [1], [0], [0], [0, 0, 1, 0], [], []>} : vector<8x128xf32>, vector<128x128xf32>, vector<8x128xf32> -> vector<8x128xf32>
    %7 = arith.addf %3, %6 : vector<8x128xf32>
    %c0_6 = arith.constant 0 : index
    %c0_7 = arith.constant 0 : index
    %8 = vector.load %arg7[%c0_6, %c0_7] : memref<8x128xf32, #tpu.memory_space<vmem>>, vector<8x128xf32>
    tpu.vector_store %arg7[%c0_6, %c0_7], %7 {strides = array<i32>} : memref<8x128xf32, #tpu.memory_space<vmem>>, vector<8x128xf32>,
    %c0_i32_8 = arith.constant 0 : i32
    %9 = arith.cmpi eq, %arg2, %c0_i32_8 : i32
    %10 = arith.extui %9 : i1 to i32
    %c0_i32_9 = arith.constant 0 : i32
    %11 = arith.cmpi ne, %10, %c0_i32_9 : i32
    scf.if %11 {
      %c0_10 = arith.constant 0 : index
      %c0_11 = arith.constant 0 : index
      %12 = vector.load %arg7[%c0_10, %c0_11] : memref<8x128xf32, #tpu.memory_space<vmem>>, vector<8x128xf32>
      %c0_12 = arith.constant 0 : index
      %c0_13 = arith.constant 0 : index
      %13 = vector.load %arg5[%c0_12, %c0_13] : memref<1x128xf32, #tpu.memory_space<vmem>>, vector<1x128xf32>
      %14 = vector.broadcast %13 : vector<1x128xf32> to vector<8x128xf32>
      %15 = arith.addf %12, %14 : vector<8x128xf32>
      %cst_14 = arith.constant 0.000000e+00 : f32
      %16 = vector.broadcast %cst_14 : f32 to vector<8x128xf32>
      %17 = arith.maximumf %15, %16 : vector<8x128xf32>
      %c0_15 = arith.constant 0 : index
      %c0_16 = arith.constant 0 : index
      %18 = vector.load %arg6[%c0_15, %c0_16] : memref<8x128xf32, #tpu.memory_space<vmem>>, vector<8x128xf32>
      tpu.vector_store %arg6[%c0_15, %c0_16], %17 {strides = array<i32>} : memref<8x128xf32, #tpu.memory_space<vmem>>, vector<8x128xf32>,
    } else {
    }
    return
  }
  func.func @transform_0(%arg0: i32, %arg1: i32, %arg2: i32) -> (i32, i32) {
    %c0_i32 = arith.constant 0 : i32
    return %arg0, %arg2 : i32, i32
  }
  func.func @transform_1(%arg0: i32, %arg1: i32, %arg2: i32) -> (i32, i32) {
    %c0_i32 = arith.constant 0 : i32
    return %arg1, %arg2 : i32, i32
  }
  func.func @transform_2(%arg0: i32, %arg1: i32, %arg2: i32) -> (i32, i32) {
    %c0_i32 = arith.constant 0 : i32
    %c0_i32_0 = arith.constant 0 : i32
    return %c0_i32, %arg1 : i32, i32
  }
  func.func @transform_3(%arg0: i32, %arg1: i32, %arg2: i32) -> (i32, i32) {
    %c0_i32 = arith.constant 0 : i32
    return %arg0, %arg1 : i32, i32
  }
}

</mosaic_0001>

<bundles_post_ra>
// kernel: tpu_custom_call.1
= control target key start
LH: loop header
LB: loop body
LE: loop exit
PB: predicated region body
PF: predicated region fallthrough
CT: control target
= control target key end

     0   :  { %8 = vsyncpa [#allocation4], 0  ;;  %s397_s0 = inlined_call_operand.hbm [shape: f32[8,128], index: 0, kind: input, shape index: {}]   ;;  %s398_s1 = inlined_call_operand.hbm [shape: f32[128,128], index: 1, kind: input, shape index: {}]   ;;  %s399_s2 = inlined_call_operand.vmem [shape: f32[1,128], index: 2, kind: input, shape index: {}]   ;;  %s400_s3 = inlined_call_operand.hbm [shape: f32[8,128], index: 3, kind: output, shape index: {}]  }
   0x1   :  { %9 = vsyncpa [#allocation7], 0 }
   0x2   :  { %10 = vsyncpa [#allocation5], 0  ;;  %s323_s12 = smov [#allocation3]   ;;  %s324_s14 = smov [#allocation6]  }
   0x3   :  { %s17_s13 = sshll.u32 %s323_s12, 4  ;;  %s26_s15 = sshll.u32 %s324_s14, 4  ;;  %s18_s13 = int_to_ptr.vmem [resolvable:$true] %s17_s13  ;;  %s351_s15 = int_to_ptr.vmem [resolvable:$true] %s26_s15 }
   0x4   :  { %s251_s18 = scalar_lea.hbm %s397_s0, 128 }
   0x5   :  { %p252_p0 = scmp.ne.s32.totalorder %s397_s0, %s251_s18  ;;  %p255_p1 = scmp.lt.u32.totalorder %s251_s18, %s397_s0 }
   0x7   :  { %p257_p2 = pnand %p255_p1, %p252_p0 }
   0x9   :  { %260 = shalt.err (!%p257_p2)
}
   0xa   :  { %s261_s23 = scalar_lea.vmem %s18_s13, 128  ;;  %p266_p4 = scmp.lt.s32.totalorder %s18_s13, %s18_s13 }
   0xb   :  { %p262_p3 = scmp.ne.s32.totalorder %s18_s13, %s261_s23  ;;  %p267_p5 = scmp.lt.s32.totalorder %s261_s23, %s261_s23 }
   0xd   :  { %p268_p6 = por %p267_p5, %p266_p4 }
   0xf   :  { %p269_p7 = pnand %p268_p6, %p262_p3 }
  0x11   :  { %272 = shalt.err (!%p269_p7)
}
  0x12   :  { %20 = dma.hbm_to_vmem [thread:$0]  %s397_s0, 128, %s18_s13, [#allocation4]  }
  0x13   :  { %s273_s28 = scalar_lea.hbm %s398_s1, 2048 }
  0x14   :  { %p274_p8 = scmp.ne.s32.totalorder %s398_s1, %s273_s28  ;;  %p277_p9 = scmp.lt.u32.totalorder %s273_s28, %s398_s1 }
  0x16   :  { %p279_p10 = pnand %p277_p9, %p274_p8 }
  0x18   :  { %282 = shalt.err (!%p279_p10)
}
  0x19   :  { %s283_s6 = scalar_lea.vmem %s351_s15, 2048  ;;  %p288_p12 = scmp.lt.s32.totalorder %s351_s15, %s351_s15 }
  0x1a   :  { %p284_p11 = scmp.ne.s32.totalorder %s351_s15, %s283_s6  ;;  %p289_p13 = scmp.lt.s32.totalorder %s283_s6, %s283_s6 }
  0x1c   :  { %p290_p0 = por %p289_p13, %p288_p12 }
  0x1e   :  { %p291_p1 = pnand %p290_p0, %p284_p11 }
  0x20   :  { %294 = shalt.err (!%p291_p1)
}
  0x21   :  { %s325_s0 = smov 128   ;;  %s326_s7 = smov 8  }
  0x22   :  { %32 = dma.hbm_to_vmem [thread:$0]  %s398_s1, 2048, %s351_s15, [#allocation7], %s325_s0, %s325_s0, %s326_s7  }
  0x23   :  { %317 = dma.done.wait [#allocation4], 128  }
  0x24   :  { %318 = vsyncadd [#allocation4], 4294967168 }
  0x25   :  { %319 = dma.done.wait [#allocation7], 2048  }
  0x26   :  { %320 = vsyncadd [#allocation7], 4294965248  ;;  %v327_v0 = vmov 0.0|0.0   ;;  %vm328_vm0 = vmmov 0   ;;  %v329_v1 = vmov 0.0   ;;  %v48_v2 = vld [vmem:[#allocation6] sm:$0xff] }
  0x27   :  { %219 = vmatprep.subr.bf16.mxu0 %v327_v0  ;;  %216 = vmatprep.mubr.msk.f32.mxu0 %vm328_vm0, %v329_v1  ;;  %v49_v3 = vld [vmem:[#allocation6 + $0x8] sm:$0xff]  ;;  %v50_v5 = vld [vmem:[#allocation6 + $0x10] sm:$0xff]  ;;  %v51_v6 = vld [vmem:[#allocation6 + $0x18] sm:$0xff]  ;;  %s330_s11 = smov [#allocation8]  }
  0x28   :  { %v220_v4 = vpack.c.bf16 %v49_v3, %v48_v2  ;;  %v223_v7 = vpack.c.bf16 %v51_v6, %v50_v5  ;;  %v52_v8 = vld [vmem:[#allocation6 + $0x20] sm:$0xff]  ;;  %v53_v9 = vld [vmem:[#allocation6 + $0x28] sm:$0xff]  ;;  %v54_v11 = vld [vmem:[#allocation6 + $0x30] sm:$0xff]  ;;  %s156_s12 = sshll.u32 %s330_s11, 4  ;;  %s157_s12 = int_to_ptr.vmem [resolvable:$true] %s156_s12 }
  0x29   :  { %v226_v10 = vpack.c.bf16 %v53_v9, %v52_v8  ;;  %v55_v12 = vld [vmem:[#allocation6 + $0x38] sm:$0xff]  ;;  %v56_v14 = vld [vmem:[#allocation6 + $0x40] sm:$0xff]  ;;  %v57_v15 = vld [vmem:[#allocation6 + $0x48] sm:$0xff]  ;;  %s295_s13 = scalar_lea.vmem %s157_s12, 128  ;;  %p300_p3 = scmp.lt.s32.totalorder %s157_s12, %s157_s12 }
  0x2a   :  { %221 = vmatpush3.bf16.xpose.msra.mxu0 %v220_v4  ;;  %v229_v13 = vpack.c.bf16 %v55_v12, %v54_v11  ;;  %v232_v16 = vpack.c.bf16 %v57_v15, %v56_v14  ;;  %v58_v17 = vld [vmem:[#allocation6 + $0x50] sm:$0xff]  ;;  %v59_v18 = vld [vmem:[#allocation6 + $0x58] sm:$0xff]  ;;  %v60_v20 = vld [vmem:[#allocation6 + $0x60] sm:$0xff]  ;;  %p296_p2 = scmp.ne.s32.totalorder %s157_s12, %s295_s13  ;;  %p301_p4 = scmp.lt.s32.totalorder %s295_s13, %s295_s13 }
  0x2b   :  { %222 = vmatprep.subr.bf16.mxu0 %v327_v0  ;;  %v235_v19 = vpack.c.bf16 %v59_v18, %v58_v17  ;;  %v61_v21 = vld [vmem:[#allocation6 + $0x68] sm:$0xff]  ;;  %v62_v23 = vld [vmem:[#allocation6 + $0x70] sm:$0xff]  ;;  %v63_v24 = vld [vmem:[#allocation6 + $0x78] sm:$0xff] }
  0x2c   :  { %v238_v22 = vpack.c.bf16 %v61_v21, %v60_v20  ;;  %v241_v25 = vpack.c.bf16 %v63_v24, %v62_v23  ;;  %v47_v26 = vld [vmem:[#allocation3] sm:$0xff]  ;;  %p302_p5 = por %p301_p4, %p300_p3 }
  0x2d   :  { %v166_v27 = vld [vmem:[%s399_s2] ss:$0 sm:$0xff] }
  0x2e   :  { %p303_p6 = pnand %p302_p5, %p296_p2 }
  0x32   :  { %224 = vmatpush3.bf16.xpose.msra.mxu0 %v223_v7 }
  0x33   :  { %225 = vmatprep.subr.bf16.mxu0 %v327_v0 }
  0x3a   :  { %227 = vmatpush3.bf16.xpose.msra.mxu0 %v226_v10 }
  0x3b   :  { %228 = vmatprep.subr.bf16.mxu0 %v327_v0 }
  0x42   :  { %230 = vmatpush3.bf16.xpose.msra.mxu0 %v229_v13 }
  0x43   :  { %231 = vmatprep.subr.bf16.mxu0 %v327_v0 }
  0x4a   :  { %233 = vmatpush3.bf16.xpose.msra.mxu0 %v232_v16 }
  0x4b   :  { %234 = vmatprep.subr.bf16.mxu0 %v327_v0 }
  0x52   :  { %236 = vmatpush3.bf16.xpose.msra.mxu0 %v235_v19 }
  0x53   :  { %237 = vmatprep.subr.bf16.mxu0 %v327_v0 }
  0x5a   :  { %239 = vmatpush3.bf16.xpose.msra.mxu0 %v238_v22 }
  0x5b   :  { %240 = vmatprep.subr.bf16.mxu0 %v327_v0 }
  0x62   :  { %242 = vmatpush3.bf16.xpose.msra.mxu0 %v241_v25 }
  0x69   :  { %217 = vmatmul.mubr.f32.vlgmr.msra.gmra.mrb[0].mxu0 %v47_v26 }
 0x13c   :  { %v130_v28 = vpop.f32.mrb[0].mxu0 }
 0x13d   :  { %v147_v29 = vadd.f32 %v166_v27, %v130_v28  ;;  %v218_v30 = vpop.f32.mrb[1].mxu0 }
 0x13f   :  { %v148_v31 = vmax.f32 %v147_v29, 0.0 }
 0x141   :  { %149 = vst [vmem:[#allocation8] sm:$0xff] %v148_v31 }
 0x142   :  { %306 = shalt.err (!%p303_p6)
}
 0x143   :  { %s307_s16 = scalar_lea.hbm %s400_s3, 128 }
 0x144   :  { %p308_p7 = scmp.ne.s32.totalorder %s400_s3, %s307_s16  ;;  %p311_p8 = scmp.lt.u32.totalorder %s307_s16, %s400_s3 }
 0x146   :  { %p313_p9 = pnand %p311_p8, %p308_p7 }
 0x148   :  { %316 = shalt.err (!%p313_p9)
}
 0x149   :  { %159 = dma.vmem_to_hbm [thread:$0]  %s157_s12, 128, %s400_s3, [#allocation5]  }
 0x14a   :  { %321 = dma.done.wait [#allocation5], 128  }
 0x14b   :  { %322 = vsyncadd [#allocation5], 4294967168 }
 0x14c   :  { %163 = vsyncpa [#allocation4], 1 }
 0x14d   :  { %164 = vsyncpa [#allocation7], 1 }
 0x14e   :  { %165 = vsyncpa [#allocation5], 1 }

</bundles_post_ra>
